<compile_context>
chip_gen: v7x
topology: tpu7x:2x2x1
jax: 0.10.0
libtpu: 0.0.40
codegen_flags: <defaults>
</compile_context>

<pallas_src>
import jax
import jax.numpy as jnp
from jax.experimental import pallas as pl
from jax.experimental.pallas import tpu as pltpu


def _round_up(n, m):
    return ((n + m - 1) // m) * m


def _mlp_kernel(xT_ref, w1_ref, b1_ref, w2_ref, b2_ref, w3_ref, b3_ref, o_ref):
    # One (36, TB) tile of transposed activations per grid step; the whole
    # 3-layer MLP runs on it in VMEM.  Matmuls accumulate in f32 on the MXU,
    # bias-add / ReLU run lane-dense on the VPU, and the (5, TB) output tile
    # is written with full-lane (unmasked) stores.
    xT = xT_ref[...]                                                        # (36, TB)
    h1 = jnp.dot(w1_ref[...], xT, preferred_element_type=jnp.float32) + b1_ref[...]
    h1 = jnp.maximum(h1, 0.0)                                               # (18, TB)
    h2 = jnp.dot(w2_ref[...], h1, preferred_element_type=jnp.float32) + b2_ref[...]
    h2 = jnp.maximum(h2, 0.0)                                               # (9, TB)
    out = jnp.dot(w3_ref[...], h2, preferred_element_type=jnp.float32) + b3_ref[...]
    o_ref[...] = out.astype(o_ref.dtype)                                    # (5, TB)


def ann_model_forward(x, params, *, tile_b=2048):
    """x: (B, 36) float32.  params: W1 (18,36), b1 (18,1), W2 (9,18), b2 (9,1),
    W3 (5,9), b3 (5,1)  (PyTorch nn.Linear layout).  Returns (B, 5) float32.

    NOTE: for tiny B (a handful of rows) the fixed pallas_call overhead
    dominates and plain XLA is the better choice; this kernel pays off once B
    is in the thousands.
    """
    B, F_in = x.shape
    w1, b1 = params["W1"], params["b1"]
    w2, b2 = params["W2"], params["b2"]
    w3, b3 = params["W3"], params["b3"]
    n_out = w3.shape[0]

    # Batch (lane) tile: a multiple of 128 lanes, capped by the padded batch.
    tile_b = max(128, _round_up(int(tile_b), 128))
    TB = min(tile_b, _round_up(B, 128))
    Bp = _round_up(B, TB)
    num_tiles = Bp // TB

    # One transpose + pad in the wrapper -> lane-dense (36, Bp) operand.
    xT = jnp.pad(x, ((0, Bp - B), (0, 0))).T

    const = lambda shape: pl.BlockSpec(shape, lambda i: (0, 0))

    weight_bytes = sum(int(a.size) * a.dtype.itemsize
                       for a in (w1, b1, w2, b2, w3, b3))
    cost = pl.CostEstimate(
        flops=2 * Bp * (36 * 18 + 18 * 9 + 9 * 5),
        transcendentals=0,
        bytes_accessed=Bp * (F_in + n_out) * 4 + weight_bytes,
    )

    outT = pl.pallas_call(
        _mlp_kernel,
        out_shape=jax.ShapeDtypeStruct((n_out, Bp), jnp.float32),
        grid=(num_tiles,),
        in_specs=[
            pl.BlockSpec((F_in, TB), lambda i: (0, i)),   # x tile: batch on lanes
            const(w1.shape), const(b1.shape),             # weights/biases: resident
            const(w2.shape), const(b2.shape),
            const(w3.shape), const(b3.shape),
        ],
        out_specs=pl.BlockSpec((n_out, TB), lambda i: (0, i)),
        compiler_params=pltpu.CompilerParams(
            dimension_semantics=("parallel",),            # shard batch tiles across TCs (v7x)
        ),
        cost_estimate=cost,
    )(xT, w1, b1, w2, b2, w3, b3)

    return outT.T[:B]


def init_params(key):
    """Deterministic init mimicking nn.Linear's default
    U(-1/sqrt(fan_in), 1/sqrt(fan_in)), stored in PyTorch layout:
    W (out_features, in_features), b (out_features, 1)."""
    dims = [(36, 18), (18, 9), (9, 5)]
    params = {}
    keys = jax.random.split(key, 2 * len(dims))
    for i, (fan_in, fan_out) in enumerate(dims):
        bound = 1.0 / (fan_in ** 0.5)
        w = jax.random.uniform(keys[2 * i], (fan_out, fan_in),
                               minval=-bound, maxval=bound, dtype=jnp.float32)
        b = jax.random.uniform(keys[2 * i + 1], (fan_out, 1),
                               minval=-bound, maxval=bound, dtype=jnp.float32)
        params[f"W{i + 1}"] = w
        params[f"b{i + 1}"] = b
    return params


def _reference_forward(x, params):
    h1 = jnp.maximum(x @ params["W1"].T + params["b1"][:, 0], 0.0)
    h2 = jnp.maximum(h1 @ params["W2"].T + params["b2"][:, 0], 0.0)
    return h2 @ params["W3"].T + params["b3"][:, 0]


if __name__ == "__main__":
    key = jax.random.PRNGKey(0)
    k_param, k_x = jax.random.split(key)
    params = init_params(k_param)

    # Small but non-trivial: B=300 is not a multiple of the 128-lane tile, so
    # padding + a multi-step (grid=(3,)) pipelined run are both exercised.
    B = 300
    x = jax.random.normal(k_x, (B, 36), dtype=jnp.float32)

    out = ann_model_forward(x, params, tile_b=128)
    out = jax.block_until_ready(out)

    ref = _reference_forward(x, params)
    assert out.shape == (B, 5), out.shape
    assert jnp.allclose(out, ref, atol=1e-5, rtol=1e-5), "mismatch vs reference"

    print("KERNEL_OK")
</pallas_src>

<mosaic_0001>
module attributes {stable_mosaic.version = 11 : i64} {
  func.func @_mlp_kernel(%arg0: i32, %arg1: memref<36x128xf32, #tpu.memory_space<vmem>>, %arg2: memref<18x36xf32, #tpu.memory_space<vmem>>, %arg3: memref<18x1xf32, #tpu.memory_space<vmem>>, %arg4: memref<9x18xf32, #tpu.memory_space<vmem>>, %arg5: memref<9x1xf32, #tpu.memory_space<vmem>>, %arg6: memref<5x9xf32, #tpu.memory_space<vmem>>, %arg7: memref<5x1xf32, #tpu.memory_space<vmem>>, %arg8: memref<5x128xf32, #tpu.memory_space<vmem>>) attributes {dimension_semantics = [#tpu.dimension_semantics<parallel>], iteration_bounds = array<i64: 3>, scalar_prefetch = 0 : i64, scratch_operands = 0 : i64, tpu.core_type = #tpu.core_type<tc>, window_params = [{transform_indices = @transform_0, window_bounds = array<i64: 36, 128>}, {pipeline_mode = #tpu.pipeline_mode<synchronous>, transform_indices = @transform_1, window_bounds = array<i64: 18, 36>}, {pipeline_mode = #tpu.pipeline_mode<synchronous>, transform_indices = @transform_2, window_bounds = array<i64: 18, 1>}, {pipeline_mode = #tpu.pipeline_mode<synchronous>, transform_indices = @transform_3, window_bounds = array<i64: 9, 18>}, {pipeline_mode = #tpu.pipeline_mode<synchronous>, transform_indices = @transform_4, window_bounds = array<i64: 9, 1>}, {pipeline_mode = #tpu.pipeline_mode<synchronous>, transform_indices = @transform_5, window_bounds = array<i64: 5, 9>}, {pipeline_mode = #tpu.pipeline_mode<synchronous>, transform_indices = @transform_6, window_bounds = array<i64: 5, 1>}, {transform_indices = @transform_7, window_bounds = array<i64: 5, 128>}]} {
    %c0 = arith.constant 0 : index
    %c0_0 = arith.constant 0 : index
    %0 = vector.load %arg1[%c0, %c0_0] : memref<36x128xf32, #tpu.memory_space<vmem>>, vector<36x128xf32>
    %c0_1 = arith.constant 0 : index
    %c0_2 = arith.constant 0 : index
    %1 = vector.load %arg2[%c0_1, %c0_2] : memref<18x36xf32, #tpu.memory_space<vmem>>, vector<18x36xf32>
    %cst = arith.constant dense<0.000000e+00> : vector<18x128xf32>
    %2 = tpu.matmul %1, %0, %cst {dimension_numbers = #tpu.dot_dimension_numbers<[1], [0], [0], [1], [0, 0, 1, 1], [], []>} : vector<18x36xf32>, vector<36x128xf32>, vector<18x128xf32> -> vector<18x128xf32>
    %c0_3 = arith.constant 0 : index
    %c0_4 = arith.constant 0 : index
    %3 = vector.load %arg3[%c0_3, %c0_4] : memref<18x1xf32, #tpu.memory_space<vmem>>, vector<18x1xf32>
    %4 = vector.broadcast %3 : vector<18x1xf32> to vector<18x128xf32>
    %5 = arith.addf %2, %4 : vector<18x128xf32>
    %cst_5 = arith.constant 0.000000e+00 : f32
    %6 = vector.broadcast %cst_5 : f32 to vector<18x128xf32>
    %7 = arith.maximumf %5, %6 : vector<18x128xf32>
    %c0_6 = arith.constant 0 : index
    %c0_7 = arith.constant 0 : index
    %8 = vector.load %arg4[%c0_6, %c0_7] : memref<9x18xf32, #tpu.memory_space<vmem>>, vector<9x18xf32>
    %cst_8 = arith.constant dense<0.000000e+00> : vector<9x128xf32>
    %9 = tpu.matmul %8, %7, %cst_8 {dimension_numbers = #tpu.dot_dimension_numbers<[1], [0], [0], [1], [0, 0, 1, 1], [], []>} : vector<9x18xf32>, vector<18x128xf32>, vector<9x128xf32> -> vector<9x128xf32>
    %c0_9 = arith.constant 0 : index
    %c0_10 = arith.constant 0 : index
    %10 = vector.load %arg5[%c0_9, %c0_10] : memref<9x1xf32, #tpu.memory_space<vmem>>, vector<9x1xf32>
    %11 = vector.broadcast %10 : vector<9x1xf32> to vector<9x128xf32>
    %12 = arith.addf %9, %11 : vector<9x128xf32>
    %cst_11 = arith.constant 0.000000e+00 : f32
    %13 = vector.broadcast %cst_11 : f32 to vector<9x128xf32>
    %14 = arith.maximumf %12, %13 : vector<9x128xf32>
    %c0_12 = arith.constant 0 : index
    %c0_13 = arith.constant 0 : index
    %15 = vector.load %arg6[%c0_12, %c0_13] : memref<5x9xf32, #tpu.memory_space<vmem>>, vector<5x9xf32>
    %cst_14 = arith.constant dense<0.000000e+00> : vector<5x128xf32>
    %16 = tpu.matmul %15, %14, %cst_14 {dimension_numbers = #tpu.dot_dimension_numbers<[1], [0], [0], [1], [0, 0, 1, 1], [], []>} : vector<5x9xf32>, vector<9x128xf32>, vector<5x128xf32> -> vector<5x128xf32>
    %c0_15 = arith.constant 0 : index
    %c0_16 = arith.constant 0 : index
    %17 = vector.load %arg7[%c0_15, %c0_16] : memref<5x1xf32, #tpu.memory_space<vmem>>, vector<5x1xf32>
    %18 = vector.broadcast %17 : vector<5x1xf32> to vector<5x128xf32>
    %19 = arith.addf %16, %18 : vector<5x128xf32>
    %c0_17 = arith.constant 0 : index
    %c0_18 = arith.constant 0 : index
    %20 = vector.load %arg8[%c0_17, %c0_18] : memref<5x128xf32, #tpu.memory_space<vmem>>, vector<5x128xf32>
    tpu.vector_store %arg8[%c0_17, %c0_18], %19 {strides = array<i32>} : memref<5x128xf32, #tpu.memory_space<vmem>>, vector<5x128xf32>,
    return
  }
  func.func @transform_0(%arg0: i32) -> (i32, i32) {
    %c0_i32 = arith.constant 0 : i32
    %c0_i32_0 = arith.constant 0 : i32
    return %c0_i32, %arg0 : i32, i32
  }
  func.func @transform_1(%arg0: i32) -> (i32, i32) {
    %c0_i32 = arith.constant 0 : i32
    %c0_i32_0 = arith.constant 0 : i32
    %c0_i32_1 = arith.constant 0 : i32
    return %c0_i32, %c0_i32_0 : i32, i32
  }
  func.func @transform_2(%arg0: i32) -> (i32, i32) {
    %c0_i32 = arith.constant 0 : i32
    %c0_i32_0 = arith.constant 0 : i32
    %c0_i32_1 = arith.constant 0 : i32
    return %c0_i32, %c0_i32_0 : i32, i32
  }
  func.func @transform_3(%arg0: i32) -> (i32, i32) {
    %c0_i32 = arith.constant 0 : i32
    %c0_i32_0 = arith.constant 0 : i32
    %c0_i32_1 = arith.constant 0 : i32
    return %c0_i32, %c0_i32_0 : i32, i32
  }
  func.func @transform_4(%arg0: i32) -> (i32, i32) {
    %c0_i32 = arith.constant 0 : i32
    %c0_i32_0 = arith.constant 0 : i32
    %c0_i32_1 = arith.constant 0 : i32
    return %c0_i32, %c0_i32_0 : i32, i32
  }
  func.func @transform_5(%arg0: i32) -> (i32, i32) {
    %c0_i32 = arith.constant 0 : i32
    %c0_i32_0 = arith.constant 0 : i32
    %c0_i32_1 = arith.constant 0 : i32
    return %c0_i32, %c0_i32_0 : i32, i32
  }
  func.func @transform_6(%arg0: i32) -> (i32, i32) {
    %c0_i32 = arith.constant 0 : i32
    %c0_i32_0 = arith.constant 0 : i32
    %c0_i32_1 = arith.constant 0 : i32
    return %c0_i32, %c0_i32_0 : i32, i32
  }
  func.func @transform_7(%arg0: i32) -> (i32, i32) {
    %c0_i32 = arith.constant 0 : i32
    %c0_i32_0 = arith.constant 0 : i32
    return %c0_i32, %arg0 : i32, i32
  }
}

</mosaic_0001>

<bundles_post_ra>
// kernel: tpu_custom_call.1
= control target key start
LH: loop header
LB: loop body
LE: loop exit
PB: predicated region body
PF: predicated region fallthrough
CT: control target
= control target key end

     0   :  { %12 = vsyncpa [#allocation3], 0  ;;  %s1186_s0 = inlined_call_operand.hbm [shape: f32[36,384], index: 0, kind: input, shape index: {}]   ;;  %s1187_s1 = inlined_call_operand.vmem [shape: f32[18,36], index: 1, kind: input, shape index: {}]   ;;  %s1188_s2 = inlined_call_operand.vmem [shape: f32[18,1], index: 2, kind: input, shape index: {}]   ;;  %s1189_s3 = inlined_call_operand.vmem [shape: f32[9,18], index: 3, kind: input, shape index: {}]   ;;  %s1190_s4 = inlined_call_operand.vmem [shape: f32[9,1], index: 4, kind: input, shape index: {}]   ;;  %s1191_s5 = inlined_call_operand.vmem [shape: f32[5,9], index: 5, kind: input, shape index: {}]   ;;  %s1192_s6 = inlined_call_operand.vmem [shape: f32[5,1], index: 6, kind: input, shape index: {}]   ;;  %s1193_s7 = inlined_call_operand.hbm [shape: f32[5,384], index: 7, kind: output, shape index: {}]  }
   0x1   :  { %14 = vsyncpa [#allocation3 + $0x1], 0 }
   0x2   :  { %15 = vsyncpa [#allocation4], 0 }
   0x3   :  { %17 = vsyncpa [#allocation4 + $0x1], 0  ;;  %s981_s24 = smov 0   ;;  %s983_s25 = smov 0  }
   0x4   :  { %s985_s26 = smov 0   ;;  %s987_s27 = smov 0  }
   0x5 LB: > { %s1002_s28 = sadd.s32 4294967295, %s929_s27   ;;  %s691_s29 = sadd.s32 4294967294, %s929_s27   ;;  %s929_s27 = sphi %s987_s27, %s1205_s27   ;;  %s925_s26 = sphi %s985_s26, %s1204_s26   ;;  %s921_s25 = sphi %s983_s25, %s1203_s25   ;;  %s917_s24 = sphi %s981_s24, %s1202_s24  }
   0x6   : > { %s1006_s30 = sadd.s32 1, %s929_s27   ;;  %s30_s8 = sadd.s32 1, %s925_s26 }
   0x7   : > { %s27_s9 = ssub.s32 %s929_s27, %s1006_s30  ;;  %p37_p0 = scmp.ne.s32.totalorder %s925_s26, %s921_s25 }
   0x8   : > { %p28_p1 = scmp.eq.s32.totalorder %s27_s9, 0  ;;  %p38_p2 = scmp.eq.s32.totalorder %s929_s27, 0 }
   0x9   : > { %p43_p3 = scmp.ne.s32.totalorder %s921_s25, %s917_s24  ;;  %p44_p4 = scmp.eq.s32.totalorder %s1002_s28, 0 }
   0xa   : > { %s1018_s10 = scalar_select %p28_p1, %s925_s26, %s30_s8  }
   0xb   : > { %p39_p5 = por %p38_p2, %p37_p0  ;;  %p1020_p6 = por %p44_p4, %p43_p3 }
   0xc   : > { %p193_p7 = scmp.eq.s32.totalorder %s1002_s28, 2  ;;  %p199_p8 = scmp.eq.s32.totalorder %s691_s29, 2 }
   0xd   : > { %p789_p9 = scmp.lt.s32.totalorder %s929_s27, 3  ;;  %s237_s14 = sand.u32 1, %s925_s26  }
   0xe   : > { %p1026_p10 = por %p193_p7, %p37_p0  ;;  %p1030_p11 = por %p199_p8, %p43_p3 }
   0xf   : > { %s694_s15 = sshll.u32 %s929_s27, 7  ;;  %s775_s16 = smul.u32 40, %s237_s14 }
  0x10   : > { %s1196_s12 = scalar_select %p1026_p10, 1, 0 }
  0x11   : > { %s1197_s13 = scalar_select %p1030_p11, 1, 0 }
  0x12   : > { %s1039_s19 = scalar_lea.hbm %s1186_s0, %s694_s15  ;;  %p1041_p12 = pnand %p789_p9, %p39_p5 }
  0x13   : > { %s241_s21 = scalar_lea.vmem [#allocation2], %s775_s16  ;;  %s1048_s23 = scalar_lea.sflag [#allocation3], %s237_s14 }
  0x14   : > { %s247_s22 = sshll.u32 %s241_s21, 4  ;;  %s833_s29 = scalar_lea.hbm %s1039_s19, 640  ;;  %s1045_s22 = int_to_ptr.vmem [resolvable:$true] %s247_s22 }
  0x15   : > { %p834_p0 = scmp.ne.s32.totalorder %s1039_s19, %s833_s29  ;;  %p835_p1 = pneg %p1041_p12 }
  0x16   : > { %s838_s15 = scalar_lea.hbm %s1186_s0, 1920  ;;  %p839_p4 = scmp.lt.u32.totalorder %s1039_s19, %s1186_s0 }
  0x17   : > { %p836_p2 = pnand %p835_p1, %p834_p0  ;;  %p840_p5 = scmp.lt.u32.totalorder %s838_s15, %s833_s29 }
  0x18   : > { %p842_p8 = scmp.lt.u32.totalorder %s833_s29, %s1039_s19 }
  0x19   : > { %p837_p3 = pneg %p836_p2  ;;  %p841_p7 = por %p840_p5, %p839_p4 }
  0x1b   : > { %p843_p9 = por %p842_p8, %p841_p7 }
  0x1d   : > { %p844_p13 = pnand %p843_p9, %p837_p3 }
  0x1f   : > { %847 = shalt.err (!%p844_p13)
}
  0x20   : > { %s848_s14 = scalar_lea.vmem %s1045_s22, 640  ;;  %s931_s18 = smov [#allocation2]  }
  0x21   : > { %p849_p0 = scmp.ne.s32.totalorder %s1045_s22, %s848_s14  ;;  %s853_s21 = sshll.u32 %s931_s18, 4  ;;  %s854_s21 = int_to_ptr.vmem [resolvable:$false] %s853_s21 }
  0x22   : > { %s855_s8 = scalar_lea.vmem %s854_s21, 1280  ;;  %p856_p10 = scmp.lt.s32.totalorder %s1045_s22, %s854_s21 }
  0x23   : > { %p851_p2 = pnand %p849_p0, %p835_p1  ;;  %p857_p4 = scmp.lt.s32.totalorder %s855_s8, %s848_s14 }
  0x25   : > { %p852_p11 = pneg %p851_p2  ;;  %p858_p5 = por %p857_p4, %p856_p10 }
  0x27   : > { %p859_p7 = pnand %p858_p5, %p852_p11 }
  0x29   : > { %862 = shalt.err (!%p859_p7)
}
  0x2a   : > { %s932_s29 = smov 384   ;;  %s933_s9 = smov 128  }
  0x2b   : > { %s934_s15 = smov 8   ;;  %p255_p13 = scmp.lt.s32.totalorder %s929_s27, 4 }
  0x2c   : > { %784 = dma.hbm_to_vmem [thread:$0]  (!%p1041_p12), %s1039_s19, 640, %s1045_s22, %s1048_s23, %s932_s29, %s933_s9, %s934_s15  }
  0x2d   : > { %p1199_p1 = scmp.ge.s32.totalorder %s929_s27, 1 }
  0x2f   : > { %p256_p3 = pnand %p1199_p1, %p255_p13 }
  0x30   : > { %s1080_s17 = sand.u32 (!%p256_p3), 1, %s921_s25  }
  0x31   : > { %259 = sbr.rel (%p256_p3) target bundleno = 748 (0x2ec), region = 48  ;;  %s262_s14 = scalar_lea.sflag (!%p256_p3), [#allocation3], %s1080_s17 }
  0x32   : > { %s776_s16 = smul.u32 (!%p256_p3), 40, %s1080_s17 }
  0x34   : > { %s265_s18 = scalar_lea.vmem (!%p256_p3), [#allocation2], %s776_s16 }
  0x38   : > { %908 = dma.done.wait (%p1020_p6), %s262_s14, 640  }
  0x39   : > { %910 = vsyncadd (%p1020_p6), %s262_s14, 4294966656  ;;  %v935_v0 = vmov 0.0|0.0   ;;  %vm936_vm0 = vmmov 0   ;;  %v937_v1 = vmov 0.0   ;;  %v938_v2 = vmov 0   ;;  %v296_v3 = vld [vmem:[%s265_s18] sm:$0xff] }
  0x3a   : > { %761 = vmatprep.subr.bf16.mxu0 %v935_v0  ;;  %736 = vmatprep.mubr.msk.f32.mxu0 %vm936_vm0, %v937_v1  ;;  %v297_v4 = vld [vmem:[%s265_s18 + $0x8] sm:$0xff]  ;;  %v298_v5 = vld [vmem:[%s265_s18 + $0x10] sm:$0xff]  ;;  %v299_v7 = vld [vmem:[%s265_s18 + $0x18] sm:$0xff]  ;;  %vm332_vm1 = vcmask 1043456   ;;  %vm322_vm2 = vcmask 293888   ;;  %vm433_vm3 = vcmask 146432  }
  0x3b   : > { %831 = vset.pattern.permute.xlu0 %v938_v2  ;;  %832 = vset.pattern.permute.xlu1 %v938_v2  ;;  %v762_v6 = vpack.c.bf16 %v297_v4, %v296_v3  ;;  %v304_v8 = vld [vmem:[%s1188_s2] sm:$0xff]  ;;  %v765_v9 = vpack.c.bf16 %v299_v7, %v298_v5  ;;  %v306_v10 = vld [vmem:[%s1188_s2 + $0x10] sm:$0x3]  ;;  %v305_v11 = vld [vmem:[%s1188_s2 + $0x8] sm:$0xff]  ;;  %vm440_vm4 = vcmask 1041408   ;;  %vm532_vm5 = vcmask 1040384  }
  0x3c   : > { %309 = vperm.xlu0 %831, %v304_v8   ;;  %319 = vperm.xlu1 %832, %v306_v10   ;;  %v421_v12 = vld [vmem:[%s1190_s4] sm:$0xff]  ;;  %v422_v14 = vld [vmem:[%s1190_s4 + $0x8] sm:$0x1]  ;;  %v303_v18 = vld [vmem:[%s1187_s1 + $0x10] sm:$0x3]  ;;  %vm939_vm6 = vmmov 1  }
  0x3d   : > { %763 = vmatpush3.bf16.msra.mxu0 %v762_v6  ;;  %v300_v13 = vld [vmem:[%s265_s18 + $0x20] sm:$0xf]  ;;  %vm773_vm7 = vmpackc.low %vm532_vm5, %vm939_vm6  ;;  %vm528_vm8 = vcmask 72704   ;;  %s696_s14 = sshll.u32 %s1080_s17, 3  ;;  %s707_s19 = sshll.u32 %s1002_s28, 7 }
  0x3e   : > { %764 = vmatprep.subr.bf16.mxu0 %v935_v0  ;;  %v301_v15 = vld [vmem:[%s1187_s1] sm:$0xff]  ;;  %v302_v17 = vld [vmem:[%s1187_s1 + $0x8] sm:$0xff]  ;;  %s295_s20 = scalar_lea.vmem [#allocation5], %s696_s14  ;;  %s1143_s23 = scalar_lea.hbm %s1193_s7, %s707_s19 }
  0x3f   : > { %v522_v16 = vld [vmem:[%s1192_s6] sm:$0x1f]  ;;  %v420_v36 = vld [vmem:[%s1189_s3 + $0x8] sm:$0x1]  ;;  %s621_s18 = sshll.u32 %s295_s20, 4  ;;  %s608_s21 = scalar_lea.sflag [#allocation4], %s1080_s17  ;;  %s1145_s18 = int_to_ptr.vmem [resolvable:$true] %s621_s18 }
  0x40   : > { %314 = vperm.xlu0 %831, %v305_v11   ;;  %425 = vperm.xlu1 %832, %v421_v12   ;;  %v419_v19 = vld [vmem:[%s1189_s3] sm:$0xff]  ;;  %s863_s8 = scalar_lea.vmem %s1145_s18, 128  ;;  %p1200_p10 = scmp.ne.s32.totalorder %s1196_s12, 0 }
  0x41   : > { %766 = vmatpush3.bf16.msra.mxu0 %v765_v9  ;;  %751 = vmatprep.mubr.msk.f32.mxu1 %vm433_vm3, %v419_v19  ;;  %v521_v46 = vld [vmem:[%s1191_s5] sm:$0x1f]  ;;  %p864_p6 = scmp.ne.s32.totalorder %s1145_s18, %s863_s8  ;;  %s940_s28 = smov [#allocation5]  }
  0x42   : > { %734 = vmatprep.subr.mxu0 %v937_v1  ;;  %s867_s29 = sshll.u32 %s940_s28, 4  ;;  %s868_s29 = int_to_ptr.vmem [resolvable:$false] %s867_s29 }
  0x43   : > { %p865_p11 = pnand %p864_p6, %p1200_p10  ;;  %s869_s9 = scalar_lea.vmem %s868_s29, 256 }
  0x44   : > { %430 = vperm.xlu0 %831, %v422_v14   ;;  %525 = vperm.xlu1 %832, %v522_v16   ;;  %p870_p8 = scmp.lt.s32.totalorder %s1145_s18, %s868_s29  ;;  %p871_p9 = scmp.lt.s32.totalorder %s869_s9, %s863_s8 }
  0x45   : > { %735 = vmatpush3.msk.msra.mxu0 %vm332_vm1, %v300_v13  ;;  %p866_p12 = pneg %p865_p11 }
  0x46   : > { %737 = vmatmul.mubr.msk.f32.vlgmr.msra.gmra.mrb[0].mxu0 %vm322_vm2, %v301_v15  ;;  %p872_p0 = por %p871_p9, %p870_p8 }
  0x47   : > { %739 = vmatprep.mubr.msk.f32.mxu0 %vm936_vm0, %v937_v1 }
  0x48   : > { %p873_p2 = pnand %p872_p0, %p866_p12 }
  0x4a   : > { %740 = vmatmul.mubr.msk.f32.gmra.mrb[2].mxu0 %vm322_vm2, %v302_v17 }
  0x4b   : > { %742 = vmatprep.mubr.msk.f32.mxu0 %vm936_vm0, %v937_v1 }
  0x4e   : > { %743 = vmatmul.mubr.msk.f32.gmra.mrb[4].mxu0 %vm322_vm2, %v303_v18 }
  0xbb   : > { %v310_v20 = vpop.permute.xlu0 %309  ;;  %v320_v30 = vpop.permute.xlu1 %319 }
  0xbf   : > { %v315_v24 = vpop.permute.xlu0 %314  ;;  %v426_v39 = vpop.permute.xlu1 %425 }
  0xc3   : > { %v431_v37 = vpop.permute.xlu0 %430  ;;  %v526_v47 = vpop.permute.xlu1 %525 }
 0x119   : > { %v402_v21 = vpop.f32.mrb[0].mxu0 }
 0x11a   : > { %v738_v22 = vpop.f32.mrb[1].mxu0  ;;  %v403_v23 = vadd.f32 %v402_v21, %v310_v20 }
 0x11c   : > { %v416_v28 = vmax.f32 %v403_v23, 0.0 }
 0x11d   : > { %v407_v25 = vpop.f32.mrb[2].mxu0 }
 0x11e   : > { %v408_v26 = vadd.f32 %v407_v25, %v315_v24  ;;  %v741_v27 = vpop.f32.mrb[3].mxu0 }
 0x120   : > { %v417_v29 = vmax.f32 %v408_v26, 0.0 }
 0x121   : > { %v412_v31 = vpop.f32.mrb[4].mxu0 }
 0x122   : > { %v413_v32 = vadd.f32 %v412_v31, %v320_v30  ;;  %v744_v33 = vpop.f32.mrb[5].mxu0  ;;  %v767_v34 = vpack.c.bf16 %v417_v29, %v416_v28 }
 0x124   : > { %v418_v35 = vmax.f32 %v413_v32, 0.0  ;;  %768 = vmatprep.subr.bf16.mxu1 %v767_v34 }
 0x125   : > { %770 = vmatpush3.bf16.msra.mxu1 %v767_v34 }
 0x126   : > { %749 = vmatprep.subr.msk.mxu1 %vm440_vm4, %v418_v35 }
 0x129   : > { %750 = vmatpush3.msk.msra.mxu1 %vm440_vm4, %v418_v35 }
 0x12a   : > { %752 = vmatmul.mubr.msk.f32.vlgmr.msra.gmra.mrb[0].mxu1 %vm433_vm3, %v420_v36  ;;  %771 = vmatprep.subr.bf16.mxu1 %v935_v0 }
 0x12b   : > { %758 = vmatprep.mubr.msk.f32.mxu1 %vm936_vm0, %v937_v1 }
 0x1fd   : > { %v753_v38 = vpop.f32.mrb[0].mxu1 }
 0x1fe   : > { %v516_v40 = vadd.f32 %v753_v38, %v431_v37  ;;  %v510_v41 = vpop.f32.mrb[1].mxu1 }
 0x1ff   : > { %v511_v42 = vadd.f32 %v510_v41, %v426_v39 }
 0x200   : > { %v520_v43 = vmax.f32 %v516_v40, 0.0 }
 0x201   : > { %v519_v44 = vmax.f32 %v511_v42, 0.0 }
 0x203   : > { %v772_v45 = vpack.c.bf16 %v520_v43, %v519_v44 }
 0x205   : > { %774 = vmatpush3.bf16.msk.msra.mxu1 %vm773_vm7, %v772_v45 }
 0x208   : > { %759 = vmatmul.mubr.msk.f32.vlgmr.msra.gmra.mrb[2].mxu1 %vm528_vm8, %v521_v46 }
 0x2db   : > { %v602_v48 = vpop.f32.mrb[2].mxu1 }
 0x2dc   : > { %v603_v49 = vadd.f32 %v602_v48, %v526_v47  ;;  %v760_v50 = vpop.f32.mrb[3].mxu1 }
 0x2de   : > { %606 = vst [vmem:[%s295_s20] sm:$0x1f] %v603_v49 }
 0x2df   : > { %876 = shalt.err (!%p873_p2)
}
 0x2e0   : > { %s877_s17 = scalar_lea.hbm %s1143_s23, 128  ;;  %s881_s14 = scalar_lea.hbm %s1193_s7, 384 }
 0x2e1   : > { %p878_p4 = scmp.ne.s32.totalorder %s1143_s23, %s877_s17  ;;  %p882_p13 = scmp.lt.u32.totalorder %s1143_s23, %s1193_s7 }
 0x2e2   : > { %p883_p1 = scmp.lt.u32.totalorder %s881_s14, %s877_s17  ;;  %p885_p6 = scmp.lt.u32.totalorder %s877_s17, %s1143_s23 }
 0x2e3   : > { %p879_p5 = pnand %p878_p4, %p1200_p10 }
 0x2e4   : > { %p884_p3 = por %p883_p1, %p882_p13 }
 0x2e5   : > { %p880_p7 = pneg %p879_p5 }
 0x2e6   : > { %p886_p11 = por %p885_p6, %p884_p3 }
 0x2e8   : > { %p887_p12 = pnand %p886_p11, %p880_p7 }
 0x2ea   : > { %890 = shalt.err (!%p887_p12)
}
 0x2eb   : > { %779 = dma.vmem_to_hbm [thread:$0]  (%p1200_p10), %s1145_s18, 128, %s1143_s23, %s608_s21  }
 0x2ec PF: > { %p790_p8 = scmp.ge.s32.totalorder %s929_s27, 2  ;;  %s633_s11 = sand.u32 1, %s917_s24  }
 0x2ed   : > { %p1201_p9 = scmp.ne.s32.totalorder %s1197_s13, 0  ;;  %s634_s22 = scalar_lea.sflag [#allocation4], %s633_s11 }
 0x2ef   : > { %p786_p0 = pnand %p790_p8, %p1201_p9 }
 0x2f1   : > { %912 = dma.done.wait (!%p786_p0), %s634_s22, 128  }
 0x2f2   : > { %914 = vsyncadd (!%p786_p0), %s634_s22, 4294967168  ;;  %p20_p2 = scmp.ge.s32.totalorder %s1006_s30, 5   ;;  %s1202_s24 = smov %s921_s25 }
 0x2f3   : > { %s1203_s25 = smov %s925_s26  ;;  %s1204_s26 = smov %s1018_s10 }
 0x2f4   : > { %s1205_s27 = smov %s1006_s30  ;;  %22 = sbr.rel (!%p20_p2) target bundleno = 5 (0x5), region = 93 }
 0x2fb   :  { %639 = vsyncpa [#allocation3], 1 }
 0x2fc   :  { %641 = vsyncpa [#allocation3 + $0x1], 1 }
 0x2fd   :  { %642 = vsyncpa [#allocation4], 1 }
 0x2fe   :  { %644 = vsyncpa [#allocation4 + $0x1], 1 }

</bundles_post_ra>
